<compile_context>
chip_gen: v5e
topology: v5e:2x2
jax: 0.10.0
libtpu: 0.0.40
codegen_flags: <defaults>
</compile_context>

<pallas_src>
import functools

import numpy as np
import jax
import jax.numpy as jnp
from jax.experimental import pallas as pl
from jax.experimental.pallas import tpu as pltpu

LRELU_SLOPE = 0.2
BN_EPS = 1e-5


def _round_up(x, m):
    return (x + m - 1) // m * m


# ----------------------------------------------------------------------------
# Pallas kernels
# ----------------------------------------------------------------------------

def _conv_taps(x_ref, w_ref, n, KH, KW, Wi, L):
    """Sum of the KH*KW unit-stride taps for sample `n` -> f32 (L, OC).

    x_ref: (N, Lin, Ci) row-major flattened (H*W) input, bf16 (zero tail pad)
    w_ref: (KH*KW, Ci, OC) tap-major weights, bf16
    Result rows r with (r % Wi) >= OW are horizontal "wrap" garbage; they are
    masked out of the BN statistics and sliced off by the wrapper.
    """
    acc = jnp.zeros((L, w_ref.shape[-1]), jnp.float32)
    for i in range(KH):
        for j in range(KW):
            s = i * Wi + j
            xs = x_ref[n, s:s + L, :]                          # (L, Ci) unit stride
            acc = acc + jnp.dot(xs, w_ref[i * KW + j],
                                preferred_element_type=jnp.float32)
    return acc


def _conv_bias_kernel(x_ref, w_ref, b_ref, o_ref, *, KH, KW, Wi, lrelu):
    """conv + bias (+ LeakyReLU) fused epilogue for one pass."""
    N, L = o_ref.shape[0], o_ref.shape[1]
    for n in range(N):
        acc = _conv_taps(x_ref, w_ref, n, KH, KW, Wi, L) + b_ref[...]
        if lrelu:
            acc = jnp.where(acc >= 0.0, acc, LRELU_SLOPE * acc)
        o_ref[n, :, :] = acc.astype(o_ref.dtype)


def _conv_bn_kernel(x_ref, w_ref, g_ref, b_ref, m_ref, o_ref, *, KH, KW, Wi, count):
    """conv + train-mode BatchNorm + LeakyReLU fused epilogue for one pass."""
    N, L = o_ref.shape[0], o_ref.shape[1]
    accs = [_conv_taps(x_ref, w_ref, n, KH, KW, Wi, L) for n in range(N)]
    mask = m_ref[...]                                   # (L, 1): 1.0 on valid rows
    s1 = jnp.zeros((1, o_ref.shape[-1]), jnp.float32)
    s2 = jnp.zeros_like(s1)
    for a in accs:
        am = a * mask
        s1 = s1 + jnp.sum(am, axis=0, keepdims=True)
        s2 = s2 + jnp.sum(am * a, axis=0, keepdims=True)
    inv_cnt = 1.0 / count
    mean = s1 * inv_cnt
    var = s2 * inv_cnt - mean * mean                    # biased (train-mode) variance
    scale = jax.lax.rsqrt(var + BN_EPS) * g_ref[...]
    for n in range(N):
        y = (accs[n] - mean) * scale + b_ref[...]
        y = jnp.where(y >= 0.0, y, LRELU_SLOPE * y)
        o_ref[n, :, :] = y.astype(o_ref.dtype)


def _final_logits_kernel(x_ref, w_ref, b_ref, m_ref,
                         o_sp_neg, o_sp_pos, o_mean, *, KH, KW, Wi, count):
    """Final 1-channel conv fused with the per-pass logit reductions."""
    N = x_ref.shape[0]
    L = m_ref.shape[0]
    mask = m_ref[...]
    ssp_neg = jnp.zeros((1, 1), jnp.float32)
    ssp_pos = jnp.zeros((1, 1), jnp.float32)
    ssum = jnp.zeros((1, 1), jnp.float32)
    for n in range(N):
        logit = jnp.zeros((L, 1), jnp.float32)
        for i in range(KH):
            for j in range(KW):
                s = i * Wi + j
                xs = x_ref[n, s:s + L, :].astype(jnp.float32)   # (L, IC)
                wt = w_ref[i * KW + j]                          # (1, IC)
                logit = logit + jnp.sum(xs * wt, axis=-1, keepdims=True)
        logit = logit + b_ref[...]
        # stable softplus: sp(x) = max(x, 0) + log(1 + exp(-|x|))
        t = jnp.log(1.0 + jnp.exp(-jnp.abs(logit)))
        sp_pos = jnp.maximum(logit, 0.0) + t
        sp_neg = jnp.maximum(-logit, 0.0) + t
        ssp_neg = ssp_neg + jnp.sum(sp_neg * mask, keepdims=True)
        ssp_pos = ssp_pos + jnp.sum(sp_pos * mask, keepdims=True)
        ssum = ssum + jnp.sum(logit * mask, keepdims=True)
    inv_cnt = 1.0 / count
    o_sp_neg[...] = ssp_neg * inv_cnt     # mean softplus(-logits)
    o_sp_pos[...] = ssp_pos * inv_cnt     # mean softplus(+logits)
    o_mean[...] = ssum * inv_cnt          # mean logits


def _sum_abs_kernel(x_ref, y_ref, o_ref):
    @pl.when(pl.program_id(0) == 0)
    def _():
        o_ref[...] = jnp.zeros_like(o_ref)
    o_ref[...] = o_ref[...] + jnp.sum(jnp.abs(x_ref[...] - y_ref[...]))


def _kl_kernel(mu_ref, lv_ref, o_ref):
    @pl.when(pl.program_id(0) == 0)
    def _():
        o_ref[...] = jnp.zeros_like(o_ref)
    mu = mu_ref[...]
    lv = lv_ref[...]
    # DiagonalGaussian kl(): 0.5 * sum(mean^2 + var - 1 - logvar)
    o_ref[...] = o_ref[...] + 0.5 * jnp.sum(jnp.square(mu) + jnp.exp(lv) - 1.0 - lv)


# ----------------------------------------------------------------------------
# Reduction wrappers (grid-tiled, resident (1,1) accumulator)
# ----------------------------------------------------------------------------

def _to_rows(x, lanes=128):
    flat = x.reshape(-1)
    n = flat.shape[0]
    if n % lanes == 0:
        return flat.reshape(n // lanes, lanes)
    return flat.reshape(1, n)


def _row_tile(rows, target=512):
    if rows <= target:
        return rows
    for t in range(target, 7, -1):
        if rows % t == 0 and t % 8 == 0:
            return t
    return rows


def _pallas_sum_reduce(kernel, a, b):
    a2, b2 = _to_rows(a), _to_rows(b)
    rows, lanes = a2.shape
    tile = _row_tile(rows)
    spec = pl.BlockSpec((tile, lanes), lambda i: (i, 0))
    return pl.pallas_call(
        kernel,
        out_shape=jax.ShapeDtypeStruct((1, 1), jnp.float32),
        grid=(rows // tile,),
        in_specs=[spec, spec],
        out_specs=pl.BlockSpec((1, 1), lambda i: (0, 0)),
        compiler_params=pltpu.CompilerParams(dimension_semantics=("arbitrary",)),
    )(a2, b2)[0, 0]


# ----------------------------------------------------------------------------
# Discriminator: conv layers as Pallas kernels (NHWC bf16, no im2col)
# ----------------------------------------------------------------------------

def _space_to_depth2(xp):
    """(P, N, Hp, Wp, C) -> (P, N, Hp//2, Wp//2, 4C); channel order (r, c, c_in)."""
    P, N, Hp, Wp, C = xp.shape
    x = xp.reshape(P, N, Hp // 2, 2, Wp // 2, 2, C)
    x = jnp.transpose(x, (0, 1, 2, 4, 3, 5, 6))
    return x.reshape(P, N, Hp // 2, Wp // 2, 4 * C)


def _flatten_rows(xp, kw):
    """(P, N, Hi, Wi, C) -> (P, N, Lin, C): row-major H*W flattening plus a few
    zero rows so every tap's unit-stride in-kernel slice stays in bounds."""
    P, N, Hi, Wi, C = xp.shape
    xf = xp.reshape(P, N, Hi * Wi, C)
    lin = _round_up(Hi * Wi + kw - 1, 8)
    return jnp.pad(xf, ((0, 0), (0, 0), (0, lin - Hi * Wi), (0, 0)))


def _valid_row_mask(OH, OW, Wi):
    m = (np.arange(OH * Wi) % Wi < OW).astype(np.float32)
    return jnp.asarray(m).reshape(OH * Wi, 1)


def _conv_layer(x, layer):
    """One discriminator conv block.  x: (P, N, H, W, C) bf16, P = 2 stacked
    passes (real / fake).  Each grid step handles one pass, so train-mode BN
    statistics stay per pass (matching two separate PyTorch forward calls)."""
    P, N, H, W, C = x.shape
    xp = jnp.pad(x, ((0, 0), (0, 0), (1, 1), (1, 1), (0, 0)))      # conv padding = 1
    if layer["stride"] == 2:
        xp = _space_to_depth2(xp)      # 4x4/stride-2 == 2x2/stride-1 on s2d input
        KH = KW = 2
    else:
        KH = KW = 4
    Hi, Wi = xp.shape[2], xp.shape[3]
    OH, OW = Hi - KH + 1, Wi - KW + 1
    L = OH * Wi                         # flat output rows (incl. Wi-OW wrap cols/row)
    xf = _flatten_rows(xp, KW)
    Lin, Ci = xf.shape[2], xf.shape[3]
    w = layer["w_taps"]
    OC = w.shape[-1]

    x_spec = pl.BlockSpec((None, N, Lin, Ci), lambda p: (p, 0, 0, 0))
    w_spec = pl.BlockSpec((KH * KW, Ci, OC), lambda p: (0, 0, 0))
    v_spec = pl.BlockSpec((1, OC), lambda p: (0, 0))
    o_spec = pl.BlockSpec((None, N, L, OC), lambda p: (p, 0, 0, 0))
    out_shape = jax.ShapeDtypeStruct((P, N, L, OC), jnp.bfloat16)
    cparams = pltpu.CompilerParams(dimension_semantics=("parallel",))

    if layer["mode"] == "bn_lrelu":
        mask = _valid_row_mask(OH, OW, Wi)
        kern = functools.partial(_conv_bn_kernel, KH=KH, KW=KW, Wi=Wi,
                                 count=float(N * OH * OW))
        out = pl.pallas_call(
            kern, out_shape=out_shape, grid=(P,),
            in_specs=[x_spec, w_spec, v_spec, v_spec,
                      pl.BlockSpec((L, 1), lambda p: (0, 0))],
            out_specs=o_spec, compiler_params=cparams,
        )(xf, w, layer["gamma"], layer["beta"], mask)
    else:
        kern = functools.partial(_conv_bias_kernel, KH=KH, KW=KW, Wi=Wi,
                                 lrelu=(layer["mode"] == "bias_lrelu"))
        out = pl.pallas_call(
            kern, out_shape=out_shape, grid=(P,),
            in_specs=[x_spec, w_spec, v_spec],
            out_specs=o_spec, compiler_params=cparams,
        )(xf, w, layer["bias"])

    # un-flatten and drop the wrap columns -> NHWC activations for the next layer
    return out.reshape(P, N, OH, Wi, OC)[:, :, :, :OW, :]


def _final_logit_stats(x, layer):
    """Final 1-channel conv + per-pass logit reductions.  x: (P, N, H, W, C) bf16."""
    P, N, H, W, C = x.shape
    xp = jnp.pad(x, ((0, 0), (0, 0), (1, 1), (1, 1), (0, 0)))
    KH = KW = 4
    Hi, Wi = H + 2, W + 2
    OH, OW = Hi - KH + 1, Wi - KW + 1
    L = OH * Wi
    xf = _flatten_rows(xp, KW)
    Lin, Ci = xf.shape[2], xf.shape[3]
    mask = _valid_row_mask(OH, OW, Wi)
    kern = functools.partial(_final_logits_kernel, KH=KH, KW=KW, Wi=Wi,
                             count=float(N * OH * OW))
    out11 = jax.ShapeDtypeStruct((P, 1, 1), jnp.float32)
    s_spec = pl.BlockSpec((None, 1, 1), lambda p: (p, 0, 0))
    sp_neg, sp_pos, mlog = pl.pallas_call(
        kern, out_shape=(out11, out11, out11), grid=(P,),
        in_specs=[pl.BlockSpec((None, N, Lin, Ci), lambda p: (p, 0, 0, 0)),
                  pl.BlockSpec((KH * KW, 1, Ci), lambda p: (0, 0, 0)),
                  pl.BlockSpec((1, 1), lambda p: (0, 0)),
                  pl.BlockSpec((L, 1), lambda p: (0, 0))],
        out_specs=(s_spec, s_spec, s_spec),
        compiler_params=pltpu.CompilerParams(dimension_semantics=("parallel",)),
    )(xf, layer["w_taps"], layer["bias"], mask)
    return sp_neg, sp_pos, mlog


def init_discriminator_params(key, input_nc=3, ndf=64, n_layers=3):
    """NLayerDiscriminator (PatchGAN) params with weights_init semantics:
    conv weight ~ N(0, 0.02), BN gamma ~ N(1, 0.02), BN beta = 0.
    Conv biases set to zero for determinism (weights_init leaves them at
    PyTorch's default init)."""
    keys = iter(jax.random.split(key, 2 * (n_layers + 2)))

    def conv_w(k, oc, ic, ks=4):
        return 0.02 * jax.random.normal(k, (oc, ic, ks, ks), jnp.float32)

    def s2_taps(w):
        # 4x4/stride-2 weights -> 2x2/stride-1 taps over space-to-depth input.
        oc, ic = w.shape[0], w.shape[1]
        wt = jnp.transpose(w, (2, 3, 1, 0)).reshape(2, 2, 2, 2, ic, oc)
        wt = jnp.transpose(wt, (0, 2, 1, 3, 4, 5)).reshape(4, 4 * ic, oc)
        return wt.astype(jnp.bfloat16)

    def s1_taps(w):
        oc, ic = w.shape[0], w.shape[1]
        return jnp.transpose(w, (2, 3, 1, 0)).reshape(16, ic, oc).astype(jnp.bfloat16)

    layers = []
    # layer 0: conv(input_nc -> ndf, k4 s2 p1) + bias + LeakyReLU(0.2)
    w0 = conv_w(next(keys), ndf, input_nc)
    layers.append(dict(stride=2, mode="bias_lrelu", w_taps=s2_taps(w0),
                       bias=jnp.zeros((1, ndf), jnp.float32)))
    nf = 1
    for n in range(1, n_layers):
        nf_prev, nf = nf, min(2 ** n, 8)
        oc, ic = ndf * nf, ndf * nf_prev
        w = conv_w(next(keys), oc, ic)
        layers.append(dict(
            stride=2, mode="bn_lrelu", w_taps=s2_taps(w),
            gamma=1.0 + 0.02 * jax.random.normal(next(keys), (1, oc), jnp.float32),
            beta=jnp.zeros((1, oc), jnp.float32)))
    nf_prev, nf = nf, min(2 ** n_layers, 8)
    oc, ic = ndf * nf, ndf * nf_prev
    w = conv_w(next(keys), oc, ic)
    layers.append(dict(
        stride=1, mode="bn_lrelu", w_taps=s1_taps(w),
        gamma=1.0 + 0.02 * jax.random.normal(next(keys), (1, oc), jnp.float32),
        beta=jnp.zeros((1, oc), jnp.float32)))
    # final conv(oc -> 1, k4 s1 p1) + bias, fused with the logit reductions
    wf = conv_w(next(keys), 1, oc)
    layers.append(dict(
        stride=1, mode="final",
        w_taps=jnp.transpose(wf, (2, 3, 0, 1)).reshape(16, 1, oc).astype(jnp.float32),
        bias=jnp.zeros((1, 1), jnp.float32)))
    return layers


def discriminator_logit_stats(layers, imgs_nhwc):
    """imgs_nhwc: (2, N, H, W, C) f32; pass 0 = real, pass 1 = fake."""
    x = imgs_nhwc.astype(jnp.bfloat16)
    for layer in layers[:-1]:
        x = _conv_layer(x, layer)
    return _final_logit_stats(x, layers[-1])


# ----------------------------------------------------------------------------
# LossPND.forward
# ----------------------------------------------------------------------------

def loss_pnd_forward(inputs, reconstructions, post_mean, post_logvar, logvar_param,
                     disc_layers, global_step, *,
                     disc_start=0, disc_factor_cfg=1.0, kl_weight=1.0,
                     discriminator_weight=1.0):
    # adopt_weight
    disc_factor = jnp.where(jnp.asarray(global_step) >= disc_start,
                            disc_factor_cfg, 0.0)

    N = inputs.shape[0]
    numel = float(np.prod(inputs.shape))

    # rec_loss = l1(inputs, reconstructions); only its full sum is needed.
    sum_abs = _pallas_sum_reduce(_sum_abs_kernel, inputs, reconstructions)

    # TODO(synk): perceptual (LPIPS) loss skipped (perceptual_weight treated as 0)
    # -- the pretrained VGG feature network cannot be reproduced in-script.

    exp_logvar = jnp.exp(logvar_param)
    nll_loss = (sum_abs / exp_logvar + logvar_param * numel) / N
    calibration = (sum_abs / exp_logvar - numel) / N
    rec_loss_mean = sum_abs / numel

    kl_sum = _pallas_sum_reduce(_kl_kernel, post_mean, post_logvar)
    kl_loss = kl_sum / N

    # Discriminator: real & fake passes share one pallas_call per layer via a
    # leading "pass" grid axis; BN statistics stay per pass.
    imgs = jnp.transpose(jnp.stack([inputs, reconstructions], axis=0),
                         (0, 1, 3, 4, 2))                      # NCHW -> NHWC
    sp_neg, sp_pos, mlog = discriminator_logit_stats(disc_layers, imgs)
    sp_real = sp_neg[0, 0, 0]     # mean softplus(-logits_real)
    sp_fake = sp_pos[1, 0, 0]     # mean softplus( logits_fake)
    m_real = mlog[0, 0, 0]
    m_fake = mlog[1, 0, 0]

    d_loss = 0.5 * (sp_real + sp_fake) * disc_factor
    g_loss = -m_fake

    # calibrate=False branch of LossPND.
    # TODO(synk): calibrate=True adaptive d_weight (autograd on last_layer) not implemented.
    loss = nll_loss + kl_weight * kl_loss + discriminator_weight * g_loss * disc_factor

    log = {"scalars": {
        "loss": loss,
        "logvar": logvar_param,
        "kl_loss": kl_loss,
        "nll_loss": nll_loss,
        "rec_loss": rec_loss_mean,
        "calibration": calibration,
        "g_loss": g_loss,
        "d_loss": d_loss,
        "logits_real": m_real,
        "logits_fake": m_fake,
    }}

    # TODO(synk): train_op (Adam step + lr decay on the discriminator) is an
    # optimizer side effect with no forward-kernel equivalent; returned as None.
    return loss, log, None


# ----------------------------------------------------------------------------
# main
# ----------------------------------------------------------------------------

if __name__ == "__main__":
    key = jax.random.PRNGKey(0)
    k1, k2, k3, k4, k5 = jax.random.split(key, 5)

    N, C, H, W = 2, 3, 32, 32          # image inputs / reconstructions (NCHW)
    ZC, ZH, ZW = 16, 8, 8              # latent posterior moments

    inputs = jax.random.normal(k1, (N, C, H, W), jnp.float32)
    reconstructions = inputs + 0.1 * jax.random.normal(k2, (N, C, H, W), jnp.float32)
    post_mean = jax.random.normal(k3, (N, ZC, ZH, ZW), jnp.float32)
    post_logvar = 0.1 * jax.random.normal(k4, (N, ZC, ZH, ZW), jnp.float32)

    logvar_param = jnp.float32(0.0)    # nn.Parameter(ones(()) * logvar_init)
    disc_layers = init_discriminator_params(k5, input_nc=3, ndf=64, n_layers=3)

    loss, log, _ = loss_pnd_forward(inputs, reconstructions, post_mean, post_logvar,
                                    logvar_param, disc_layers, global_step=0)
    jax.block_until_ready(loss)
    _ = {k: float(v) for k, v in log["scalars"].items()}  # force all scalars
    print("KERNEL_OK")
</pallas_src>

<mosaic_0001>
module attributes {stable_mosaic.version = 11 : i64} {
  func.func @_sum_abs_kernel(%arg0: i32, %arg1: memref<48x128xf32, #tpu.memory_space<vmem>>, %arg2: memref<48x128xf32, #tpu.memory_space<vmem>>, %arg3: memref<1x1xf32, #tpu.memory_space<vmem>>) attributes {dimension_semantics = [#tpu.dimension_semantics<arbitrary>], iteration_bounds = array<i64: 1>, scalar_prefetch = 0 : i64, scratch_operands = 0 : i64, tpu.core_type = #tpu.core_type<tc>, window_params = [{transform_indices = @transform_0, window_bounds = array<i64: 48, 128>}, {transform_indices = @transform_1, window_bounds = array<i64: 48, 128>}, {pipeline_mode = #tpu.pipeline_mode<synchronous>, transform_indices = @transform_2, window_bounds = array<i64: 1, 1>}]} {
    %c0_i32 = arith.constant 0 : i32
    %0 = arith.cmpi eq, %arg0, %c0_i32 : i32
    %1 = arith.extui %0 : i1 to i32
    %c0_i32_0 = arith.constant 0 : i32
    %2 = arith.cmpi ne, %1, %c0_i32_0 : i32
    scf.if %2 {
      %cst_8 = arith.constant 0.000000e+00 : f32
      %15 = vector.broadcast %cst_8 : f32 to vector<1x1xf32>
      %c0_9 = arith.constant 0 : index
      %c0_10 = arith.constant 0 : index
      %16 = vector.load %arg3[%c0_9, %c0_10] : memref<1x1xf32, #tpu.memory_space<vmem>>, vector<1x1xf32>
      tpu.vector_store %arg3[%c0_9, %c0_10], %15 {strides = array<i32>} : memref<1x1xf32, #tpu.memory_space<vmem>>, vector<1x1xf32>,
    } else {
    }
    %c0 = arith.constant 0 : index
    %c0_1 = arith.constant 0 : index
    %3 = vector.load %arg3[%c0, %c0_1] : memref<1x1xf32, #tpu.memory_space<vmem>>, vector<1x1xf32>
    %c0_2 = arith.constant 0 : index
    %c0_3 = arith.constant 0 : index
    %4 = vector.load %arg1[%c0_2, %c0_3] : memref<48x128xf32, #tpu.memory_space<vmem>>, vector<48x128xf32>
    %c0_4 = arith.constant 0 : index
    %c0_5 = arith.constant 0 : index
    %5 = vector.load %arg2[%c0_4, %c0_5] : memref<48x128xf32, #tpu.memory_space<vmem>>, vector<48x128xf32>
    %6 = arith.subf %4, %5 : vector<48x128xf32>
    %7 = math.absf %6 : vector<48x128xf32>
    %8 = vector.shape_cast %7 : vector<48x128xf32> to vector<1x48x128xf32>
    %cst = arith.constant dense<0.000000e+00> : vector<1xf32>
    %9 = vector.multi_reduction <add>, %8, %cst [1, 2] : vector<1x48x128xf32> to vector<1xf32>
    %10 = vector.shape_cast %9 : vector<1xf32> to vector<1x1x1xf32>
    %11 = vector.extract %10[0, 0, 0] : f32 from vector<1x1x1xf32>
    %12 = vector.broadcast %11 : f32 to vector<1x1xf32>
    %13 = arith.addf %3, %12 : vector<1x1xf32>
    %c0_6 = arith.constant 0 : index
    %c0_7 = arith.constant 0 : index
    %14 = vector.load %arg3[%c0_6, %c0_7] : memref<1x1xf32, #tpu.memory_space<vmem>>, vector<1x1xf32>
    tpu.vector_store %arg3[%c0_6, %c0_7], %13 {strides = array<i32>} : memref<1x1xf32, #tpu.memory_space<vmem>>, vector<1x1xf32>,
    return
  }
  func.func @transform_0(%arg0: i32) -> (i32, i32) {
    %c0_i32 = arith.constant 0 : i32
    %c0_i32_0 = arith.constant 0 : i32
    return %arg0, %c0_i32 : i32, i32
  }
  func.func @transform_1(%arg0: i32) -> (i32, i32) {
    %c0_i32 = arith.constant 0 : i32
    %c0_i32_0 = arith.constant 0 : i32
    return %arg0, %c0_i32 : i32, i32
  }
  func.func @transform_2(%arg0: i32) -> (i32, i32) {
    %c0_i32 = arith.constant 0 : i32
    %c0_i32_0 = arith.constant 0 : i32
    %c0_i32_1 = arith.constant 0 : i32
    return %c0_i32, %c0_i32_0 : i32, i32
  }
}

</mosaic_0001>

<bundles_post_ra>
// kernel: tpu_custom_call.1
= control target key start
LH: loop header
LB: loop body
LE: loop exit
PB: predicated region body
PF: predicated region fallthrough
CT: control target
= control target key end

     0   :  { %7 = vsyncpa [#allocation3], 0  ;;  %s229_s0 = inlined_call_operand.hbm [shape: f32[48,128], index: 0, kind: input, shape index: {}]   ;;  %s230_s1 = inlined_call_operand.hbm [shape: f32[48,128], index: 1, kind: input, shape index: {}]   ;;  %s231_s2 = inlined_call_operand.hbm [shape: f32[1,1], index: 2, kind: output, shape index: {}]  }
   0x1   :  { %8 = vsyncpa [#allocation6], 0 }
   0x2   :  { %9 = vsyncpa [#allocation4], 0  ;;  %s14_s11 = sshll.u32 %s229_s0, 4  ;;  %s197_s12 = smov [#allocation2]   ;;  %s15_s11 = int_to_ptr.hbm [resolvable:$true] %s14_s11 }
   0x3   :  { %s16_s13 = sshll.u32 %s197_s12, 4  ;;  %s27_s16 = sshll.u32 %s230_s1, 4  ;;  %s17_s13 = int_to_ptr.vmem [resolvable:$true] %s16_s13  ;;  %s28_s16 = int_to_ptr.hbm [resolvable:$true] %s27_s16 }
   0x4   :  { %s198_s17 = smov 128   ;;  %s199_s18 = smov 8  }
   0x5   :  { %22 = dma.hbm_to_vmem [thread:$0]  %s15_s11, 768, %s17_s13, [#allocation3], %s198_s17, %s198_s17, %s199_s18  }
   0x6   :  { %s200_s19 = smov [#allocation5]  }
   0x7   :  { %s29_s20 = sshll.u32 %s200_s19, 4  ;;  %s30_s20 = int_to_ptr.vmem [resolvable:$true] %s29_s20 }
   0x8   :  { %35 = dma.hbm_to_vmem [thread:$0]  %s28_s16, 768, %s30_s20, [#allocation6], %s198_s17, %s198_s17, %s199_s18  }
   0x9   :  { %191 = dma.done.wait [#allocation3], 768  }
   0xa   :  { %192 = vsyncadd [#allocation3], 4294966528 }
   0xb   :  { %193 = dma.done.wait [#allocation6], 768  }
   0xc   :  { %194 = vsyncadd [#allocation6], 4294966528  ;;  %v51_v0 = vld [vmem:[#allocation2] sm:$0xff]  ;;  %v52_v1 = vld [vmem:[#allocation2 + $0x8] sm:$0xff]  ;;  %vm48_vm0 = vcmask 0   ;;  %v201_v29 = vmov 0.0  }
   0xd   :  { %v53_v2 = vld [vmem:[#allocation2 + $0x10] sm:$0xff]  ;;  %v54_v3 = vld [vmem:[#allocation2 + $0x18] sm:$0xff]  ;;  %v55_v4 = vld [vmem:[#allocation2 + $0x20] sm:$0xff]  ;;  %49 = vst.msk [vmem:[#allocation7] sm:$0x1] %vm48_vm0, %v201_v29  ;;  %s202_s0 = smov [#allocation7]  }
   0xe   :  { %v57_v5 = vld [vmem:[#allocation5] sm:$0xff]  ;;  %v58_v6 = vld [vmem:[#allocation5 + $0x8] sm:$0xff]  ;;  %v59_v7 = vld [vmem:[#allocation5 + $0x10] sm:$0xff]  ;;  %s98_s1 = sshll.u32 %s202_s0, 4  ;;  %s100_s23 = sshll.u32 %s231_s2, 4  ;;  %s99_s1 = int_to_ptr.vmem [resolvable:$true] %s98_s1  ;;  %s101_s23 = int_to_ptr.hbm [resolvable:$true] %s100_s23 }
   0xf   :  { %v60_v8 = vld [vmem:[#allocation5 + $0x18] sm:$0xff]  ;;  %v61_v9 = vld [vmem:[#allocation5 + $0x20] sm:$0xff]  ;;  %v63_v10 = vsub.f32 %v51_v0, %v57_v5  ;;  %v64_v11 = vsub.f32 %v52_v1, %v58_v6  ;;  %v65_v12 = vsub.f32 %v53_v2, %v59_v7  ;;  %v62_v14 = vld [vmem:[#allocation5 + $0x28] sm:$0xff] }
  0x10   :  { %v56_v13 = vld [vmem:[#allocation2 + $0x28] sm:$0xff]  ;;  %v66_v15 = vsub.f32 %v54_v3, %v60_v8  ;;  %v67_v16 = vsub.f32 %v55_v4, %v61_v9 }
  0x11   :  { %v69_v17 = vand.u32 2147483647, %v63_v10  ;;  %v70_v18 = vand.u32 2147483647, %v64_v11  ;;  %v71_v19 = vand.u32 2147483647, %v65_v12  ;;  %v68_v20 = vsub.f32 %v56_v13, %v62_v14 }
  0x12   :  { %v72_v21 = vand.u32 2147483647, %v66_v15  ;;  %v73_v23 = vand.u32 2147483647, %v67_v16 }
  0x13   :  { %v75_v22 = vadd.f32 %v70_v18, %v69_v17  ;;  %v74_v25 = vand.u32 2147483647, %v68_v20 }
  0x14   :  { %v50_v37 = vld [vmem:[#allocation7] sm:$0x1] }
  0x15   :  { %v76_v24 = vadd.f32 %v75_v22, %v71_v19 }
  0x17   :  { %v77_v26 = vadd.f32 %v76_v24, %v72_v21 }
  0x19   :  { %v78_v27 = vadd.f32 %v77_v26, %v73_v23 }
  0x1b   :  { %v79_v28 = vadd.f32 %v78_v27, %v74_v25 }
  0x1d   :  { %80 = vadd.xlane.f32.xlu0 %v79_v28 }
  0x90   :  { %v81_v30 = vpop.xlane.xlu0 %80 }
  0x91   :  { %v82_v31 = vrot.slane %v81_v30, 4 }
  0x93   :  { %v83_v32 = vadd.f32 %v82_v31, %v81_v30 }
  0x95   :  { %v84_v33 = vrot.slane %v83_v32, 2 }
  0x97   :  { %v85_v34 = vadd.f32 %v84_v33, %v83_v32 }
  0x99   :  { %v86_v35 = vrot.slane %v85_v34, 1 }
  0x9b   :  { %v87_v36 = vadd.f32 %v86_v35, %v85_v34 }
  0x9d   :  { %111 = vpush %v87_v36 }
  0xce   :  { %s112_s24 = spop %111 }
  0xcf   :  { %v89_v38 = vstv %s112_s24 }
  0xd0   :  { %v90_v39 = vadd.f32 %v89_v38, %v50_v37 }
  0xd2   :  { %92 = vst.msk [vmem:[#allocation7] sm:$0x1] %vm48_vm0, %v90_v39 }
  0xd3   :  { %103 = dma.vmem_to_hbm [thread:$0]  %s99_s1, 16, %s101_s23, [#allocation4]  }
  0xd4   :  { %195 = dma.done.wait [#allocation4], 16  }
  0xd5   :  { %196 = vsyncadd [#allocation4], 4294967280 }
  0xd6   :  { %108 = vsyncpa [#allocation3], 1 }
  0xd7   :  { %109 = vsyncpa [#allocation6], 1 }
  0xd8   :  { %110 = vsyncpa [#allocation4], 1 }

</bundles_post_ra>
